<compile_context>
chip_gen: v7x
topology: tpu7x:2x2x1
jax: 0.10.0
libtpu: 0.0.40
codegen_flags: <defaults>
</compile_context>

<pallas_src>
import math
import functools

import jax
import jax.numpy as jnp
from jax.experimental import pallas as pl
from jax.experimental.pallas import tpu as pltpu


# ----------------------------------------------------------------------------
# Fused Pallas kernel: projections + multi-head attention + output projection
# ----------------------------------------------------------------------------

def _fused_mha_kernel(q_ref, k_ref, v_ref,
                      wq_ref, bq_ref, wk_ref, bk_ref, wv_ref, bv_ref,
                      wo_ref, bo_ref,
                      out_ref, attn0_ref,
                      ctx_ref,
                      *, head_count, dim_per_head):
    f32 = jnp.float32
    cdt = wq_ref.dtype                        # MXU operand dtype (f32 or bf16)

    bt, lq, dq = q_ref.shape
    _, lk, dkv = k_ref.shape
    dm = head_count * dim_per_head

    # Flatten (bt, L, D) -> (bt*L, D): fills the MXU with bt*L rows per pass.
    q2 = q_ref[...].reshape(bt * lq, dq).astype(cdt)
    k2 = k_ref[...].reshape(bt * lk, dkv).astype(cdt)
    v2 = v_ref[...].reshape(bt * lk, dkv).astype(cdt)

    # Projections (1/sqrt(d) pre-folded into wq/bq).  f32 accumulation, f32 bias add.
    q_p = jnp.dot(q2, wq_ref[...], preferred_element_type=f32) + bq_ref[...]   # [bt*Lq, dm]
    k_p = jnp.dot(k2, wk_ref[...], preferred_element_type=f32) + bk_ref[...]   # [bt*Lk, dm]
    v_p = jnp.dot(v2, wv_ref[...], preferred_element_type=f32) + bv_ref[...]   # [bt*Lk, dm]

    # Per-batch-row views for the attention part; cast MXU operands once.
    q_c = q_p.reshape(bt, lq, dm).astype(cdt)
    k_c = k_p.reshape(bt, lk, dm).astype(cdt)
    v_c = v_p.reshape(bt, lk, dm).astype(cdt)

    # Per-head attention (softmax stays f32).  Each head's context is written into a
    # lane-dense VMEM slab so the output projection is a single full-K matmul.
    for h in range(head_count):               # static unroll over heads
        lo = h * dim_per_head
        hi = lo + dim_per_head
        q_h = q_c[:, :, lo:hi]                # [bt, Lq, d]
        k_h = k_c[:, :, lo:hi]                # [bt, Lk, d]
        v_h = v_c[:, :, lo:hi]                # [bt, Lk, d]

        # scores = q_h @ k_h^T (batched, contracting last dims; no transpose op)
        s = jnp.einsum("bqd,bkd->bqk", q_h, k_h,
                       preferred_element_type=f32)                    # [bt, Lq, Lk]
        m = jnp.max(s, axis=-1, keepdims=True)
        p = jnp.exp(s - m)
        a = p * pl.reciprocal(jnp.sum(p, axis=-1, keepdims=True), approx=True)
        # dropout(attn): identity in eval mode.

        if h == 0:
            # Only head 0's attention is consumed by the caller.
            attn0_ref[...] = a.astype(attn0_ref.dtype)

        ctx_h = jnp.einsum("bqk,bkd->bqd", a.astype(cdt), v_h,
                           preferred_element_type=f32)                # [bt, Lq, d]
        ctx_ref[:, lo:hi] = ctx_h.reshape(bt * lq, dim_per_head)

    # One full-contraction output projection (K = dm) over the whole row slab.
    out = jnp.dot(ctx_ref[...].astype(cdt), wo_ref[...],
                  preferred_element_type=f32) + bo_ref[...]           # [bt*Lq, dm]
    out_ref[...] = out.reshape(bt, lq, dm).astype(out_ref.dtype)


def _auto_batch_tile(batch, seq_rows, target_rows=512):
    """Largest divisor of `batch` whose folded row-slab stays <= target_rows.

    Folding multiple batch rows per grid step feeds bt*L rows into each MXU pass
    (vs. L rows) and amortizes the ~0.35us per-grid-step pipeline overhead.
    Note (v7x): with very small batches, callers may prefer batch_tile=batch//2 so
    the grid stays >= 2 and both TensorCores get work.
    """
    bt = 1
    for cand in range(1, batch + 1):
        if batch % cand == 0 and cand * seq_rows <= target_rows:
            bt = cand
    return bt


def fused_mha_forward(query, key, value,
                      wq_s, bq_s, wk, bk, wv, bv, wo, bo,
                      *, head_count, dim_per_head, batch_tile=None):
    """query [B, Lq, Dq], key/value [B, Lk, Dkv] -> (out [B, Lq, Dm], attn_head0 [B, Lq, Lk])."""
    b, lq, dq = query.shape
    _, lk, dkv = key.shape
    dm = head_count * dim_per_head

    bt = batch_tile if batch_tile is not None else _auto_batch_tile(b, max(lq, lk))
    assert b % bt == 0, "batch must be divisible by batch_tile"

    f32 = jnp.float32
    bq2 = bq_s.reshape(1, dm).astype(f32)
    bk2 = bk.reshape(1, dm).astype(f32)
    bv2 = bv.reshape(1, dm).astype(f32)
    bo2 = bo.reshape(1, dm).astype(f32)

    kernel = functools.partial(_fused_mha_kernel,
                               head_count=head_count,
                               dim_per_head=dim_per_head)

    def full2d(shape):
        return pl.BlockSpec(shape, lambda i: (0, 0))

    return pl.pallas_call(
        kernel,
        out_shape=(
            jax.ShapeDtypeStruct((b, lq, dm), query.dtype),
            jax.ShapeDtypeStruct((b, lq, lk), jnp.float32),
        ),
        grid_spec=pltpu.PrefetchScalarGridSpec(
            num_scalar_prefetch=0,
            grid=(b // bt,),                                 # parallel over batch tiles
            in_specs=[
                pl.BlockSpec((bt, lq, dq), lambda i: (i, 0, 0)),
                pl.BlockSpec((bt, lk, dkv), lambda i: (i, 0, 0)),
                pl.BlockSpec((bt, lk, dkv), lambda i: (i, 0, 0)),
                full2d((dq, dm)), full2d((1, dm)),           # wq (pre-scaled), bq (pre-scaled)
                full2d((dkv, dm)), full2d((1, dm)),          # wk, bk
                full2d((dkv, dm)), full2d((1, dm)),          # wv, bv
                full2d((dm, dm)), full2d((1, dm)),           # wo, bo
            ],
            out_specs=[
                pl.BlockSpec((bt, lq, dm), lambda i: (i, 0, 0)),
                pl.BlockSpec((bt, lq, lk), lambda i: (i, 0, 0)),
            ],
            scratch_shapes=[
                pltpu.VMEM((bt * lq, dm), jnp.float32),      # lane-dense ctx slab
            ],
        ),
        compiler_params=pltpu.CompilerParams(
            dimension_semantics=("parallel",),
        ),
    )(query, key, value, wq_s, bq2, wk, bk2, wv, bv2, wo, bo2)


# ----------------------------------------------------------------------------
# Module wrapper
# ----------------------------------------------------------------------------

class MultiHeadedAttentionPallas:
    def __init__(self, head_count, kv_dim, query_dim, key, *,
                 compute_dtype=jnp.float32, batch_tile=None):
        assert kv_dim % head_count == 0
        self.head_count = head_count
        self.kv_dim = kv_dim
        self.query_dim = query_dim
        self.dim_per_head = kv_dim // head_count
        self.compute_dtype = compute_dtype
        self.batch_tile = batch_tile

        ks = jax.random.split(key, 8)

        def xavier(k, fan_in, fan_out):
            limit = math.sqrt(6.0 / (fan_in + fan_out))
            # stored as [in, out] (pre-transposed vs. torch [out, in])
            return jax.random.uniform(
                k, (fan_in, fan_out), jnp.float32, -limit, limit
            )

        def torch_linear_bias(k, fan_in, fan_out):
            bound = 1.0 / math.sqrt(fan_in)
            return jax.random.uniform(k, (fan_out,), jnp.float32, -bound, bound)

        # linear_keys / linear_values: kv_dim -> kv_dim ; linear_query: query_dim -> kv_dim
        self.wk = xavier(ks[0], kv_dim, kv_dim)
        self.bk = torch_linear_bias(ks[1], kv_dim, kv_dim)
        self.wv = xavier(ks[2], kv_dim, kv_dim)
        self.bv = torch_linear_bias(ks[3], kv_dim, kv_dim)
        self.wq = xavier(ks[4], query_dim, kv_dim)
        self.bq = torch_linear_bias(ks[5], query_dim, kv_dim)
        # final_linear: kv_dim -> kv_dim (default torch init; xavier fine for synthetic)
        self.wo = xavier(ks[6], kv_dim, kv_dim)
        self.bo = torch_linear_bias(ks[7], kv_dim, kv_dim)

        # Pre-fold the 1/sqrt(dim_per_head) softmax scale into the query projection (exact),
        # and store MXU-operand copies of the weights in the compute dtype
        # (bf16 halves weight DMA + VMEM on v6e/v7x; biases / softmax stay f32).
        scale = 1.0 / math.sqrt(self.dim_per_head)
        cd = compute_dtype
        self.wq_c = (self.wq * scale).astype(cd)
        self.bq_s = self.bq * scale
        self.wk_c = self.wk.astype(cd)
        self.wv_c = self.wv.astype(cd)
        self.wo_c = self.wo.astype(cd)

    def __call__(self, query, key, value):
        out, first_head_attn = fused_mha_forward(
            query, key, value,
            self.wq_c, self.bq_s,
            self.wk_c, self.bk,
            self.wv_c, self.bv,
            self.wo_c, self.bo,
            head_count=self.head_count,
            dim_per_head=self.dim_per_head,
            batch_tile=self.batch_tile,
        )
        return out, first_head_attn


# ----------------------------------------------------------------------------
# Reference (pure JAX, f32) for sanity check — mirrors the PyTorch module math
# ----------------------------------------------------------------------------

def reference_forward(mha, query, key, value):
    b, lq, _ = query.shape
    _, lk, _ = key.shape
    h, d = mha.head_count, mha.dim_per_head
    kp = key.reshape(-1, mha.kv_dim) @ mha.wk + mha.bk
    vp = value.reshape(-1, mha.kv_dim) @ mha.wv + mha.bv
    qp = query.reshape(-1, mha.query_dim) @ mha.wq + mha.bq
    kp = kp.reshape(b, lk, h, d).transpose(0, 2, 1, 3)
    vp = vp.reshape(b, lk, h, d).transpose(0, 2, 1, 3)
    qp = qp.reshape(b, lq, h, d).transpose(0, 2, 1, 3) / math.sqrt(d)
    scores = jnp.einsum("bhqd,bhkd->bhqk", qp, kp)
    attn = jax.nn.softmax(scores, axis=-1)
    ctx = jnp.einsum("bhqk,bhkd->bhqd", attn, vp)
    ctx = ctx.transpose(0, 2, 1, 3).reshape(b, lq, h * d)
    out = ctx.reshape(-1, mha.kv_dim) @ mha.wo + mha.bo
    return out.reshape(b, lq, mha.kv_dim), attn[:, 0]


# ----------------------------------------------------------------------------

if __name__ == "__main__":
    key0 = jax.random.PRNGKey(0)
    k_param, k_q, k_k, k_v = jax.random.split(key0, 4)

    batch = 2
    head_count = 4
    kv_dim = 32
    query_dim = 32
    q_len = 8
    k_len = 8

    query = jax.random.normal(k_q, (batch, q_len, query_dim), jnp.float32)
    key = jax.random.normal(k_k, (batch, k_len, kv_dim), jnp.float32)
    value = jax.random.normal(k_v, (batch, k_len, kv_dim), jnp.float32)

    # --- f32 compute (faithful to the PyTorch module) ---------------------------
    mha = MultiHeadedAttentionPallas(head_count, kv_dim, query_dim, k_param,
                                     compute_dtype=jnp.float32)
    out, first_head_attn = mha(query, key, value)
    jax.block_until_ready((out, first_head_attn))

    ref_out, ref_attn = reference_forward(mha, query, key, value)
    assert out.shape == (batch, q_len, kv_dim)
    assert first_head_attn.shape == (batch, q_len, k_len)
    # Tolerances account for the approx-reciprocal softmax denominator.
    assert jnp.allclose(out, ref_out, atol=5e-3, rtol=5e-3)
    assert jnp.allclose(first_head_attn, ref_attn, atol=2e-3, rtol=2e-3)

    # --- bf16 MXU operands (v6e/v7x fast path per perf review) ------------------
    mha_bf16 = MultiHeadedAttentionPallas(head_count, kv_dim, query_dim, k_param,
                                          compute_dtype=jnp.bfloat16)
    out_bf, attn_bf = mha_bf16(query, key, value)
    jax.block_until_ready((out_bf, attn_bf))
    # Loose tolerances: bf16 operand rounding (f32 accumulation & f32 softmax kept).
    assert jnp.allclose(out_bf, ref_out, atol=1e-1, rtol=1e-1)
    assert jnp.allclose(attn_bf, ref_attn, atol=2e-2, rtol=2e-2)

    print("KERNEL_OK")
</pallas_src>

<mosaic_0001>
module attributes {stable_mosaic.version = 11 : i64} {
  func.func @_fused_mha_kernel(%arg0: i32, %arg1: memref<2x8x32xf32, #tpu.memory_space<vmem>>, %arg2: memref<2x8x32xf32, #tpu.memory_space<vmem>>, %arg3: memref<2x8x32xf32, #tpu.memory_space<vmem>>, %arg4: memref<32x32xf32, #tpu.memory_space<vmem>>, %arg5: memref<1x32xf32, #tpu.memory_space<vmem>>, %arg6: memref<32x32xf32, #tpu.memory_space<vmem>>, %arg7: memref<1x32xf32, #tpu.memory_space<vmem>>, %arg8: memref<32x32xf32, #tpu.memory_space<vmem>>, %arg9: memref<1x32xf32, #tpu.memory_space<vmem>>, %arg10: memref<32x32xf32, #tpu.memory_space<vmem>>, %arg11: memref<1x32xf32, #tpu.memory_space<vmem>>, %arg12: memref<2x8x32xf32, #tpu.memory_space<vmem>>, %arg13: memref<2x8x8xf32, #tpu.memory_space<vmem>>, %arg14: memref<16x32xf32, #tpu.memory_space<vmem>>) attributes {dimension_semantics = [#tpu.dimension_semantics<parallel>], iteration_bounds = array<i64: 1>, scalar_prefetch = 0 : i64, scratch_operands = 1 : i64, tpu.core_type = #tpu.core_type<tc>, window_params = [{transform_indices = @transform_0, window_bounds = array<i64: 2, 8, 32>}, {transform_indices = @transform_1, window_bounds = array<i64: 2, 8, 32>}, {transform_indices = @transform_2, window_bounds = array<i64: 2, 8, 32>}, {pipeline_mode = #tpu.pipeline_mode<synchronous>, transform_indices = @transform_3, window_bounds = array<i64: 32, 32>}, {pipeline_mode = #tpu.pipeline_mode<synchronous>, transform_indices = @transform_4, window_bounds = array<i64: 1, 32>}, {pipeline_mode = #tpu.pipeline_mode<synchronous>, transform_indices = @transform_5, window_bounds = array<i64: 32, 32>}, {pipeline_mode = #tpu.pipeline_mode<synchronous>, transform_indices = @transform_6, window_bounds = array<i64: 1, 32>}, {pipeline_mode = #tpu.pipeline_mode<synchronous>, transform_indices = @transform_7, window_bounds = array<i64: 32, 32>}, {pipeline_mode = #tpu.pipeline_mode<synchronous>, transform_indices = @transform_8, window_bounds = array<i64: 1, 32>}, {pipeline_mode = #tpu.pipeline_mode<synchronous>, transform_indices = @transform_9, window_bounds = array<i64: 32, 32>}, {pipeline_mode = #tpu.pipeline_mode<synchronous>, transform_indices = @transform_10, window_bounds = array<i64: 1, 32>}, {transform_indices = @transform_11, window_bounds = array<i64: 2, 8, 32>}, {transform_indices = @transform_12, window_bounds = array<i64: 2, 8, 8>}]} {
    %c0 = arith.constant 0 : index
    %c0_0 = arith.constant 0 : index
    %c0_1 = arith.constant 0 : index
    %0 = vector.load %arg1[%c0, %c0_0, %c0_1] : memref<2x8x32xf32, #tpu.memory_space<vmem>>, vector<2x8x32xf32>
    %1 = vector.shape_cast %0 : vector<2x8x32xf32> to vector<16x32xf32>
    %c0_2 = arith.constant 0 : index
    %c0_3 = arith.constant 0 : index
    %c0_4 = arith.constant 0 : index
    %2 = vector.load %arg2[%c0_2, %c0_3, %c0_4] : memref<2x8x32xf32, #tpu.memory_space<vmem>>, vector<2x8x32xf32>
    %3 = vector.shape_cast %2 : vector<2x8x32xf32> to vector<16x32xf32>
    %c0_5 = arith.constant 0 : index
    %c0_6 = arith.constant 0 : index
    %c0_7 = arith.constant 0 : index
    %4 = vector.load %arg3[%c0_5, %c0_6, %c0_7] : memref<2x8x32xf32, #tpu.memory_space<vmem>>, vector<2x8x32xf32>
    %5 = vector.shape_cast %4 : vector<2x8x32xf32> to vector<16x32xf32>
    %c0_8 = arith.constant 0 : index
    %c0_9 = arith.constant 0 : index
    %6 = vector.load %arg4[%c0_8, %c0_9] : memref<32x32xf32, #tpu.memory_space<vmem>>, vector<32x32xf32>
    %cst = arith.constant dense<0.000000e+00> : vector<16x32xf32>
    %7 = tpu.matmul %1, %6, %cst {dimension_numbers = #tpu.dot_dimension_numbers<[1], [0], [0], [1], [0, 0, 1, 1], [], []>} : vector<16x32xf32>, vector<32x32xf32>, vector<16x32xf32> -> vector<16x32xf32>
    %c0_10 = arith.constant 0 : index
    %c0_11 = arith.constant 0 : index
    %8 = vector.load %arg5[%c0_10, %c0_11] : memref<1x32xf32, #tpu.memory_space<vmem>>, vector<1x32xf32>
    %9 = vector.broadcast %8 : vector<1x32xf32> to vector<16x32xf32>
    %10 = arith.addf %7, %9 : vector<16x32xf32>
    %c0_12 = arith.constant 0 : index
    %c0_13 = arith.constant 0 : index
    %11 = vector.load %arg6[%c0_12, %c0_13] : memref<32x32xf32, #tpu.memory_space<vmem>>, vector<32x32xf32>
    %cst_14 = arith.constant dense<0.000000e+00> : vector<16x32xf32>
    %12 = tpu.matmul %3, %11, %cst_14 {dimension_numbers = #tpu.dot_dimension_numbers<[1], [0], [0], [1], [0, 0, 1, 1], [], []>} : vector<16x32xf32>, vector<32x32xf32>, vector<16x32xf32> -> vector<16x32xf32>
    %c0_15 = arith.constant 0 : index
    %c0_16 = arith.constant 0 : index
    %13 = vector.load %arg7[%c0_15, %c0_16] : memref<1x32xf32, #tpu.memory_space<vmem>>, vector<1x32xf32>
    %14 = vector.broadcast %13 : vector<1x32xf32> to vector<16x32xf32>
    %15 = arith.addf %12, %14 : vector<16x32xf32>
    %c0_17 = arith.constant 0 : index
    %c0_18 = arith.constant 0 : index
    %16 = vector.load %arg8[%c0_17, %c0_18] : memref<32x32xf32, #tpu.memory_space<vmem>>, vector<32x32xf32>
    %cst_19 = arith.constant dense<0.000000e+00> : vector<16x32xf32>
    %17 = tpu.matmul %5, %16, %cst_19 {dimension_numbers = #tpu.dot_dimension_numbers<[1], [0], [0], [1], [0, 0, 1, 1], [], []>} : vector<16x32xf32>, vector<32x32xf32>, vector<16x32xf32> -> vector<16x32xf32>
    %c0_20 = arith.constant 0 : index
    %c0_21 = arith.constant 0 : index
    %18 = vector.load %arg9[%c0_20, %c0_21] : memref<1x32xf32, #tpu.memory_space<vmem>>, vector<1x32xf32>
    %19 = vector.broadcast %18 : vector<1x32xf32> to vector<16x32xf32>
    %20 = arith.addf %17, %19 : vector<16x32xf32>
    %21 = vector.shape_cast %10 : vector<16x32xf32> to vector<2x8x32xf32>
    %22 = vector.shape_cast %15 : vector<16x32xf32> to vector<2x8x32xf32>
    %23 = vector.shape_cast %20 : vector<16x32xf32> to vector<2x8x32xf32>
    %24 = vector.extract_strided_slice %21 {offsets = [0, 0, 0], sizes = [2, 8, 8], strides = [1, 1, 1]} : vector<2x8x32xf32> to vector<2x8x8xf32>
    %25 = vector.extract_strided_slice %22 {offsets = [0, 0, 0], sizes = [2, 8, 8], strides = [1, 1, 1]} : vector<2x8x32xf32> to vector<2x8x8xf32>
    %26 = vector.extract_strided_slice %23 {offsets = [0, 0, 0], sizes = [2, 8, 8], strides = [1, 1, 1]} : vector<2x8x32xf32> to vector<2x8x8xf32>
    "tpu.trace_start"() <{level = 10 : i32, message = "bqd,bkd->bqk"}> : () -> ()
    %cst_22 = arith.constant dense<0.000000e+00> : vector<2x8x8xf32>
    %27 = tpu.matmul %24, %25, %cst_22 {dimension_numbers = #tpu.dot_dimension_numbers<[2], [2], [1], [1], [0, 0, 0, 1, 1, 1], [0], [0]>} : vector<2x8x8xf32>, vector<2x8x8xf32>, vector<2x8x8xf32> -> vector<2x8x8xf32>
    "tpu.trace_stop"() : () -> ()
    %cst_23 = arith.constant dense<0xFF800000> : vector<2x8xf32>
    %28 = vector.multi_reduction <maximumf>, %27, %cst_23 [2] : vector<2x8x8xf32> to vector<2x8xf32>
    %29 = vector.shape_cast %28 : vector<2x8xf32> to vector<2x8x1xf32>
    %30 = vector.broadcast %29 : vector<2x8x1xf32> to vector<2x8x8xf32>
    %31 = arith.subf %27, %30 : vector<2x8x8xf32>
    %32 = math.exp %31 : vector<2x8x8xf32>
    %cst_24 = arith.constant dense<0.000000e+00> : vector<2x8xf32>
    %33 = vector.multi_reduction <add>, %32, %cst_24 [2] : vector<2x8x8xf32> to vector<2x8xf32>
    %34 = vector.shape_cast %33 : vector<2x8xf32> to vector<2x8x1xf32>
    %35 = tpu.reciprocal %34 {approx = true} : vector<2x8x1xf32> -> vector<2x8x1xf32>
    %36 = vector.broadcast %35 : vector<2x8x1xf32> to vector<2x8x8xf32>
    %37 = arith.mulf %32, %36 : vector<2x8x8xf32>
    %c0_25 = arith.constant 0 : index
    %c0_26 = arith.constant 0 : index
    %c0_27 = arith.constant 0 : index
    %38 = vector.load %arg13[%c0_25, %c0_26, %c0_27] : memref<2x8x8xf32, #tpu.memory_space<vmem>>, vector<2x8x8xf32>
    tpu.vector_store %arg13[%c0_25, %c0_26, %c0_27], %37 {strides = array<i32>} : memref<2x8x8xf32, #tpu.memory_space<vmem>>, vector<2x8x8xf32>,
    "tpu.trace_start"() <{level = 10 : i32, message = "bqk,bkd->bqd"}> : () -> ()
    %cst_28 = arith.constant dense<0.000000e+00> : vector<2x8x8xf32>
    %39 = tpu.matmul %37, %26, %cst_28 {dimension_numbers = #tpu.dot_dimension_numbers<[2], [1], [1], [2], [0, 0, 0, 1, 1, 2], [0], [0]>} : vector<2x8x8xf32>, vector<2x8x8xf32>, vector<2x8x8xf32> -> vector<2x8x8xf32>
    "tpu.trace_stop"() : () -> ()
    %40 = vector.shape_cast %39 : vector<2x8x8xf32> to vector<16x8xf32>
    %c0_29 = arith.constant 0 : index
    %c0_30 = arith.constant 0 : index
    %41 = vector.load %arg14[%c0_29, %c0_30] : memref<16x32xf32, #tpu.memory_space<vmem>>, vector<16x8xf32>
    tpu.vector_store %arg14[%c0_29, %c0_30], %40 {strides = array<i32>} : memref<16x32xf32, #tpu.memory_space<vmem>>, vector<16x8xf32>,
    %42 = vector.extract_strided_slice %21 {offsets = [0, 0, 8], sizes = [2, 8, 8], strides = [1, 1, 1]} : vector<2x8x32xf32> to vector<2x8x8xf32>
    %43 = vector.extract_strided_slice %22 {offsets = [0, 0, 8], sizes = [2, 8, 8], strides = [1, 1, 1]} : vector<2x8x32xf32> to vector<2x8x8xf32>
    %44 = vector.extract_strided_slice %23 {offsets = [0, 0, 8], sizes = [2, 8, 8], strides = [1, 1, 1]} : vector<2x8x32xf32> to vector<2x8x8xf32>
    "tpu.trace_start"() <{level = 10 : i32, message = "bqd,bkd->bqk"}> : () -> ()
    %cst_31 = arith.constant dense<0.000000e+00> : vector<2x8x8xf32>
    %45 = tpu.matmul %42, %43, %cst_31 {dimension_numbers = #tpu.dot_dimension_numbers<[2], [2], [1], [1], [0, 0, 0, 1, 1, 1], [0], [0]>} : vector<2x8x8xf32>, vector<2x8x8xf32>, vector<2x8x8xf32> -> vector<2x8x8xf32>
    "tpu.trace_stop"() : () -> ()
    %cst_32 = arith.constant dense<0xFF800000> : vector<2x8xf32>
    %46 = vector.multi_reduction <maximumf>, %45, %cst_32 [2] : vector<2x8x8xf32> to vector<2x8xf32>
    %47 = vector.shape_cast %46 : vector<2x8xf32> to vector<2x8x1xf32>
    %48 = vector.broadcast %47 : vector<2x8x1xf32> to vector<2x8x8xf32>
    %49 = arith.subf %45, %48 : vector<2x8x8xf32>
    %50 = math.exp %49 : vector<2x8x8xf32>
    %cst_33 = arith.constant dense<0.000000e+00> : vector<2x8xf32>
    %51 = vector.multi_reduction <add>, %50, %cst_33 [2] : vector<2x8x8xf32> to vector<2x8xf32>
    %52 = vector.shape_cast %51 : vector<2x8xf32> to vector<2x8x1xf32>
    %53 = tpu.reciprocal %52 {approx = true} : vector<2x8x1xf32> -> vector<2x8x1xf32>
    %54 = vector.broadcast %53 : vector<2x8x1xf32> to vector<2x8x8xf32>
    %55 = arith.mulf %50, %54 : vector<2x8x8xf32>
    "tpu.trace_start"() <{level = 10 : i32, message = "bqk,bkd->bqd"}> : () -> ()
    %cst_34 = arith.constant dense<0.000000e+00> : vector<2x8x8xf32>
    %56 = tpu.matmul %55, %44, %cst_34 {dimension_numbers = #tpu.dot_dimension_numbers<[2], [1], [1], [2], [0, 0, 0, 1, 1, 2], [0], [0]>} : vector<2x8x8xf32>, vector<2x8x8xf32>, vector<2x8x8xf32> -> vector<2x8x8xf32>
    "tpu.trace_stop"() : () -> ()
    %57 = vector.shape_cast %56 : vector<2x8x8xf32> to vector<16x8xf32>
    %c0_35 = arith.constant 0 : index
    %c8 = arith.constant 8 : index
    %58 = vector.load %arg14[%c0_35, %c8] : memref<16x32xf32, #tpu.memory_space<vmem>>, vector<16x8xf32>
    tpu.vector_store %arg14[%c0_35, %c8], %57 {strides = array<i32>} : memref<16x32xf32, #tpu.memory_space<vmem>>, vector<16x8xf32>,
    %59 = vector.extract_strided_slice %21 {offsets = [0, 0, 16], sizes = [2, 8, 8], strides = [1, 1, 1]} : vector<2x8x32xf32> to vector<2x8x8xf32>
    %60 = vector.extract_strided_slice %22 {offsets = [0, 0, 16], sizes = [2, 8, 8], strides = [1, 1, 1]} : vector<2x8x32xf32> to vector<2x8x8xf32>
    %61 = vector.extract_strided_slice %23 {offsets = [0, 0, 16], sizes = [2, 8, 8], strides = [1, 1, 1]} : vector<2x8x32xf32> to vector<2x8x8xf32>
    "tpu.trace_start"() <{level = 10 : i32, message = "bqd,bkd->bqk"}> : () -> ()
    %cst_36 = arith.constant dense<0.000000e+00> : vector<2x8x8xf32>
    %62 = tpu.matmul %59, %60, %cst_36 {dimension_numbers = #tpu.dot_dimension_numbers<[2], [2], [1], [1], [0, 0, 0, 1, 1, 1], [0], [0]>} : vector<2x8x8xf32>, vector<2x8x8xf32>, vector<2x8x8xf32> -> vector<2x8x8xf32>
    "tpu.trace_stop"() : () -> ()
    %cst_37 = arith.constant dense<0xFF800000> : vector<2x8xf32>
    %63 = vector.multi_reduction <maximumf>, %62, %cst_37 [2] : vector<2x8x8xf32> to vector<2x8xf32>
    %64 = vector.shape_cast %63 : vector<2x8xf32> to vector<2x8x1xf32>
    %65 = vector.broadcast %64 : vector<2x8x1xf32> to vector<2x8x8xf32>
    %66 = arith.subf %62, %65 : vector<2x8x8xf32>
    %67 = math.exp %66 : vector<2x8x8xf32>
    %cst_38 = arith.constant dense<0.000000e+00> : vector<2x8xf32>
    %68 = vector.multi_reduction <add>, %67, %cst_38 [2] : vector<2x8x8xf32> to vector<2x8xf32>
    %69 = vector.shape_cast %68 : vector<2x8xf32> to vector<2x8x1xf32>
    %70 = tpu.reciprocal %69 {approx = true} : vector<2x8x1xf32> -> vector<2x8x1xf32>
    %71 = vector.broadcast %70 : vector<2x8x1xf32> to vector<2x8x8xf32>
    %72 = arith.mulf %67, %71 : vector<2x8x8xf32>
    "tpu.trace_start"() <{level = 10 : i32, message = "bqk,bkd->bqd"}> : () -> ()
    %cst_39 = arith.constant dense<0.000000e+00> : vector<2x8x8xf32>
    %73 = tpu.matmul %72, %61, %cst_39 {dimension_numbers = #tpu.dot_dimension_numbers<[2], [1], [1], [2], [0, 0, 0, 1, 1, 2], [0], [0]>} : vector<2x8x8xf32>, vector<2x8x8xf32>, vector<2x8x8xf32> -> vector<2x8x8xf32>
    "tpu.trace_stop"() : () -> ()
    %74 = vector.shape_cast %73 : vector<2x8x8xf32> to vector<16x8xf32>
    %c0_40 = arith.constant 0 : index
    %c16 = arith.constant 16 : index
    %75 = vector.load %arg14[%c0_40, %c16] : memref<16x32xf32, #tpu.memory_space<vmem>>, vector<16x8xf32>
    tpu.vector_store %arg14[%c0_40, %c16], %74 {strides = array<i32>} : memref<16x32xf32, #tpu.memory_space<vmem>>, vector<16x8xf32>,
    %76 = vector.extract_strided_slice %21 {offsets = [0, 0, 24], sizes = [2, 8, 8], strides = [1, 1, 1]} : vector<2x8x32xf32> to vector<2x8x8xf32>
    %77 = vector.extract_strided_slice %22 {offsets = [0, 0, 24], sizes = [2, 8, 8], strides = [1, 1, 1]} : vector<2x8x32xf32> to vector<2x8x8xf32>
    %78 = vector.extract_strided_slice %23 {offsets = [0, 0, 24], sizes = [2, 8, 8], strides = [1, 1, 1]} : vector<2x8x32xf32> to vector<2x8x8xf32>
    "tpu.trace_start"() <{level = 10 : i32, message = "bqd,bkd->bqk"}> : () -> ()
    %cst_41 = arith.constant dense<0.000000e+00> : vector<2x8x8xf32>
    %79 = tpu.matmul %76, %77, %cst_41 {dimension_numbers = #tpu.dot_dimension_numbers<[2], [2], [1], [1], [0, 0, 0, 1, 1, 1], [0], [0]>} : vector<2x8x8xf32>, vector<2x8x8xf32>, vector<2x8x8xf32> -> vector<2x8x8xf32>
    "tpu.trace_stop"() : () -> ()
    %cst_42 = arith.constant dense<0xFF800000> : vector<2x8xf32>
    %80 = vector.multi_reduction <maximumf>, %79, %cst_42 [2] : vector<2x8x8xf32> to vector<2x8xf32>
    %81 = vector.shape_cast %80 : vector<2x8xf32> to vector<2x8x1xf32>
    %82 = vector.broadcast %81 : vector<2x8x1xf32> to vector<2x8x8xf32>
    %83 = arith.subf %79, %82 : vector<2x8x8xf32>
    %84 = math.exp %83 : vector<2x8x8xf32>
    %cst_43 = arith.constant dense<0.000000e+00> : vector<2x8xf32>
    %85 = vector.multi_reduction <add>, %84, %cst_43 [2] : vector<2x8x8xf32> to vector<2x8xf32>
    %86 = vector.shape_cast %85 : vector<2x8xf32> to vector<2x8x1xf32>
    %87 = tpu.reciprocal %86 {approx = true} : vector<2x8x1xf32> -> vector<2x8x1xf32>
    %88 = vector.broadcast %87 : vector<2x8x1xf32> to vector<2x8x8xf32>
    %89 = arith.mulf %84, %88 : vector<2x8x8xf32>
    "tpu.trace_start"() <{level = 10 : i32, message = "bqk,bkd->bqd"}> : () -> ()
    %cst_44 = arith.constant dense<0.000000e+00> : vector<2x8x8xf32>
    %90 = tpu.matmul %89, %78, %cst_44 {dimension_numbers = #tpu.dot_dimension_numbers<[2], [1], [1], [2], [0, 0, 0, 1, 1, 2], [0], [0]>} : vector<2x8x8xf32>, vector<2x8x8xf32>, vector<2x8x8xf32> -> vector<2x8x8xf32>
    "tpu.trace_stop"() : () -> ()
    %91 = vector.shape_cast %90 : vector<2x8x8xf32> to vector<16x8xf32>
    %c0_45 = arith.constant 0 : index
    %c24 = arith.constant 24 : index
    %92 = vector.load %arg14[%c0_45, %c24] : memref<16x32xf32, #tpu.memory_space<vmem>>, vector<16x8xf32>
    tpu.vector_store %arg14[%c0_45, %c24], %91 {strides = array<i32>} : memref<16x32xf32, #tpu.memory_space<vmem>>, vector<16x8xf32>,
    %c0_46 = arith.constant 0 : index
    %c0_47 = arith.constant 0 : index
    %93 = vector.load %arg14[%c0_46, %c0_47] : memref<16x32xf32, #tpu.memory_space<vmem>>, vector<16x32xf32>
    %c0_48 = arith.constant 0 : index
    %c0_49 = arith.constant 0 : index
    %94 = vector.load %arg10[%c0_48, %c0_49] : memref<32x32xf32, #tpu.memory_space<vmem>>, vector<32x32xf32>
    %cst_50 = arith.constant dense<0.000000e+00> : vector<16x32xf32>
    %95 = tpu.matmul %93, %94, %cst_50 {dimension_numbers = #tpu.dot_dimension_numbers<[1], [0], [0], [1], [0, 0, 1, 1], [], []>} : vector<16x32xf32>, vector<32x32xf32>, vector<16x32xf32> -> vector<16x32xf32>
    %c0_51 = arith.constant 0 : index
    %c0_52 = arith.constant 0 : index
    %96 = vector.load %arg11[%c0_51, %c0_52] : memref<1x32xf32, #tpu.memory_space<vmem>>, vector<1x32xf32>
    %97 = vector.broadcast %96 : vector<1x32xf32> to vector<16x32xf32>
    %98 = arith.addf %95, %97 : vector<16x32xf32>
    %99 = vector.shape_cast %98 : vector<16x32xf32> to vector<2x8x32xf32>
    %c0_53 = arith.constant 0 : index
    %c0_54 = arith.constant 0 : index
    %c0_55 = arith.constant 0 : index
    %100 = vector.load %arg12[%c0_53, %c0_54, %c0_55] : memref<2x8x32xf32, #tpu.memory_space<vmem>>, vector<2x8x32xf32>
    tpu.vector_store %arg12[%c0_53, %c0_54, %c0_55], %99 {strides = array<i32>} : memref<2x8x32xf32, #tpu.memory_space<vmem>>, vector<2x8x32xf32>,
    return
  }
  func.func @transform_0(%arg0: i32) -> (i32, i32, i32) {
    %c0_i32 = arith.constant 0 : i32
    %c0_i32_0 = arith.constant 0 : i32
    %c0_i32_1 = arith.constant 0 : i32
    return %arg0, %c0_i32, %c0_i32_0 : i32, i32, i32
  }
  func.func @transform_1(%arg0: i32) -> (i32, i32, i32) {
    %c0_i32 = arith.constant 0 : i32
    %c0_i32_0 = arith.constant 0 : i32
    %c0_i32_1 = arith.constant 0 : i32
    return %arg0, %c0_i32, %c0_i32_0 : i32, i32, i32
  }
  func.func @transform_2(%arg0: i32) -> (i32, i32, i32) {
    %c0_i32 = arith.constant 0 : i32
    %c0_i32_0 = arith.constant 0 : i32
    %c0_i32_1 = arith.constant 0 : i32
    return %arg0, %c0_i32, %c0_i32_0 : i32, i32, i32
  }
  func.func @transform_3(%arg0: i32) -> (i32, i32) {
    %c0_i32 = arith.constant 0 : i32
    %c0_i32_0 = arith.constant 0 : i32
    %c0_i32_1 = arith.constant 0 : i32
    return %c0_i32, %c0_i32_0 : i32, i32
  }
  func.func @transform_4(%arg0: i32) -> (i32, i32) {
    %c0_i32 = arith.constant 0 : i32
    %c0_i32_0 = arith.constant 0 : i32
    %c0_i32_1 = arith.constant 0 : i32
    return %c0_i32, %c0_i32_0 : i32, i32
  }
  func.func @transform_5(%arg0: i32) -> (i32, i32) {
    %c0_i32 = arith.constant 0 : i32
    %c0_i32_0 = arith.constant 0 : i32
    %c0_i32_1 = arith.constant 0 : i32
    return %c0_i32, %c0_i32_0 : i32, i32
  }
  func.func @transform_6(%arg0: i32) -> (i32, i32) {
    %c0_i32 = arith.constant 0 : i32
    %c0_i32_0 = arith.constant 0 : i32
    %c0_i32_1 = arith.constant 0 : i32
    return %c0_i32, %c0_i32_0 : i32, i32
  }
  func.func @transform_7(%arg0: i32) -> (i32, i32) {
    %c0_i32 = arith.constant 0 : i32
    %c0_i32_0 = arith.constant 0 : i32
    %c0_i32_1 = arith.constant 0 : i32
    return %c0_i32, %c0_i32_0 : i32, i32
  }
  func.func @transform_8(%arg0: i32) -> (i32, i32) {
    %c0_i32 = arith.constant 0 : i32
    %c0_i32_0 = arith.constant 0 : i32
    %c0_i32_1 = arith.constant 0 : i32
    return %c0_i32, %c0_i32_0 : i32, i32
  }
  func.func @transform_9(%arg0: i32) -> (i32, i32) {
    %c0_i32 = arith.constant 0 : i32
    %c0_i32_0 = arith.constant 0 : i32
    %c0_i32_1 = arith.constant 0 : i32
    return %c0_i32, %c0_i32_0 : i32, i32
  }
  func.func @transform_10(%arg0: i32) -> (i32, i32) {
    %c0_i32 = arith.constant 0 : i32
    %c0_i32_0 = arith.constant 0 : i32
    %c0_i32_1 = arith.constant 0 : i32
    return %c0_i32, %c0_i32_0 : i32, i32
  }
  func.func @transform_11(%arg0: i32) -> (i32, i32, i32) {
    %c0_i32 = arith.constant 0 : i32
    %c0_i32_0 = arith.constant 0 : i32
    %c0_i32_1 = arith.constant 0 : i32
    return %arg0, %c0_i32, %c0_i32_0 : i32, i32, i32
  }
  func.func @transform_12(%arg0: i32) -> (i32, i32, i32) {
    %c0_i32 = arith.constant 0 : i32
    %c0_i32_0 = arith.constant 0 : i32
    %c0_i32_1 = arith.constant 0 : i32
    return %arg0, %c0_i32, %c0_i32_0 : i32, i32, i32
  }
}

</mosaic_0001>

<bundles_post_ra>
// kernel: tpu_custom_call.1
= control target key start
LH: loop header
LB: loop body
LE: loop exit
PB: predicated region body
PF: predicated region fallthrough
CT: control target
= control target key end

     0   :  { %18 = vsyncpa [#allocation4], 0  ;;  %s2831_s0 = inlined_call_operand.hbm [shape: f32[2,8,32], index: 0, kind: input, shape index: {}]   ;;  %s2832_s1 = inlined_call_operand.hbm [shape: f32[2,8,32], index: 1, kind: input, shape index: {}]   ;;  %s2833_s2 = inlined_call_operand.hbm [shape: f32[2,8,32], index: 2, kind: input, shape index: {}]   ;;  %s2834_s3 = inlined_call_operand.hbm [shape: f32[32,32], index: 3, kind: input, shape index: {}]   ;;  %s2835_s4 = inlined_call_operand.vmem [shape: f32[1,32], index: 4, kind: input, shape index: {}]   ;;  %s2836_s5 = inlined_call_operand.hbm [shape: f32[32,32], index: 5, kind: input, shape index: {}]   ;;  %s2837_s6 = inlined_call_operand.vmem [shape: f32[1,32], index: 6, kind: input, shape index: {}]   ;;  %s2838_s7 = inlined_call_operand.hbm [shape: f32[32,32], index: 7, kind: input, shape index: {}]   ;;  %s2839_s8 = inlined_call_operand.hbm [shape: f32[1,32], index: 8, kind: input, shape index: {}]   ;;  %s2840_s9 = inlined_call_operand.vmem [shape: f32[32,32], index: 9, kind: input, shape index: {}]   ;;  %s2841_s10 = inlined_call_operand.vmem [shape: f32[1,32], index: 10, kind: input, shape index: {}]   ;;  %s2842_s11 = inlined_call_operand.hbm [shape: f32[2,8,32], index: 11, kind: output, shape index: {0}]   ;;  %s2843_s12 = inlined_call_operand.hbm [shape: f32[2,8,8], index: 12, kind: output, shape index: {1}]  }
   0x1   :  { %19 = vsyncpa [#allocation7], 0 }
   0x2   :  { %20 = vsyncpa [#allocation10], 0 }
   0x3   :  { %21 = vsyncpa [#allocation13], 0 }
   0x4   :  { %22 = vsyncpa [#allocation5], 0 }
   0x5   :  { %23 = vsyncpa [#allocation17], 0  ;;  %s2408_s21 = smov [#allocation6]   ;;  %s2409_s23 = smov [#allocation9]  }
   0x6   :  { %s41_s22 = sshll.u32 %s2408_s21, 4  ;;  %s65_s24 = sshll.u32 %s2409_s23, 4  ;;  %s42_s22 = int_to_ptr.vmem [resolvable:$true] %s41_s22  ;;  %s2491_s24 = int_to_ptr.vmem [resolvable:$true] %s65_s24 }
   0x7   :  { %s2198_s27 = scalar_lea.hbm %s2832_s1, 256 }
   0x8   :  { %p2199_p0 = scmp.ne.s32.totalorder %s2832_s1, %s2198_s27  ;;  %p2202_p1 = scmp.lt.u32.totalorder %s2198_s27, %s2832_s1 }
   0xa   :  { %p2204_p2 = pnand %p2202_p1, %p2199_p0 }
   0xc   :  { %2207 = shalt.err (!%p2204_p2)
}
   0xd   :  { %s2208_s14 = scalar_lea.vmem %s42_s22, 256  ;;  %p2213_p4 = scmp.lt.s32.totalorder %s42_s22, %s42_s22 }
   0xe   :  { %p2209_p3 = scmp.ne.s32.totalorder %s42_s22, %s2208_s14  ;;  %p2214_p5 = scmp.lt.s32.totalorder %s2208_s14, %s2208_s14 }
  0x10   :  { %p2215_p6 = por %p2214_p5, %p2213_p4 }
  0x12   :  { %p2216_p7 = pnand %p2215_p6, %p2209_p3 }
  0x14   :  { %2219 = shalt.err (!%p2216_p7)
}
  0x15   :  { %s2410_s15 = smov 128   ;;  %s2411_s16 = smov 8  }
  0x16   :  { %47 = dma.hbm_to_vmem [thread:$0]  %s2832_s1, 256, %s42_s22, [#allocation7], %s2410_s15, %s2410_s15, %s2411_s16  }
  0x17   :  { %s2220_s21 = scalar_lea.hbm %s2834_s3, 512 }
  0x18   :  { %p2221_p8 = scmp.ne.s32.totalorder %s2834_s3, %s2220_s21  ;;  %p2224_p9 = scmp.lt.u32.totalorder %s2220_s21, %s2834_s3 }
  0x1a   :  { %p2226_p10 = pnand %p2224_p9, %p2221_p8 }
  0x1c   :  { %2229 = shalt.err (!%p2226_p10)
}
  0x1d   :  { %s2230_s28 = scalar_lea.vmem %s2491_s24, 512  ;;  %p2235_p12 = scmp.lt.s32.totalorder %s2491_s24, %s2491_s24 }
  0x1e   :  { %p2231_p11 = scmp.ne.s32.totalorder %s2491_s24, %s2230_s28  ;;  %p2236_p13 = scmp.lt.s32.totalorder %s2230_s28, %s2230_s28 }
  0x20   :  { %p2237_p0 = por %p2236_p13, %p2235_p12 }
  0x22   :  { %p2238_p1 = pnand %p2237_p0, %p2231_p11 }
  0x24   :  { %2241 = shalt.err (!%p2238_p1)
}
  0x25   :  { %71 = dma.hbm_to_vmem [thread:$0]  %s2834_s3, 512, %s2491_s24, [#allocation10], %s2410_s15, %s2410_s15, %s2411_s16  }
  0x26   :  { %s2412_s29 = smov [#allocation12]   ;;  %s2413_s13 = smov [#allocation3]  }
  0x27   :  { %s93_s30 = sshll.u32 %s2412_s29, 4  ;;  %s29_s14 = sshll.u32 %s2413_s13, 4  ;;  %s94_s30 = int_to_ptr.vmem [resolvable:$true] %s93_s30  ;;  %s2528_s14 = int_to_ptr.vmem [resolvable:$true] %s29_s14 }
  0x28   :  { %s2242_s19 = scalar_lea.hbm %s2838_s7, 512 }
  0x29   :  { %p2243_p2 = scmp.ne.s32.totalorder %s2838_s7, %s2242_s19  ;;  %p2246_p3 = scmp.lt.u32.totalorder %s2242_s19, %s2838_s7 }
  0x2b   :  { %p2248_p4 = pnand %p2246_p3, %p2243_p2 }
  0x2d   :  { %2251 = shalt.err (!%p2248_p4)
}
  0x2e   :  { %s2252_s3 = scalar_lea.vmem %s94_s30, 512  ;;  %p2257_p6 = scmp.lt.s32.totalorder %s94_s30, %s94_s30 }
  0x2f   :  { %p2253_p5 = scmp.ne.s32.totalorder %s94_s30, %s2252_s3  ;;  %p2258_p7 = scmp.lt.s32.totalorder %s2252_s3, %s2252_s3 }
  0x31   :  { %p2259_p8 = por %p2258_p7, %p2257_p6 }
  0x33   :  { %p2260_p9 = pnand %p2259_p8, %p2253_p5 }
  0x35   :  { %2263 = shalt.err (!%p2260_p9)
}
  0x36   :  { %99 = dma.hbm_to_vmem [thread:$0]  %s2838_s7, 512, %s94_s30, [#allocation13], %s2410_s15, %s2410_s15, %s2411_s16  }
  0x37   :  { %s2264_s1 = scalar_lea.hbm %s2831_s0, 256 }
  0x38   :  { %p2265_p10 = scmp.ne.s32.totalorder %s2831_s0, %s2264_s1  ;;  %p2268_p11 = scmp.lt.u32.totalorder %s2264_s1, %s2831_s0 }
  0x3a   :  { %p2270_p12 = pnand %p2268_p11, %p2265_p10 }
  0x3c   :  { %2273 = shalt.err (!%p2270_p12)
}
  0x3d   :  { %s2274_s18 = scalar_lea.vmem %s2528_s14, 256  ;;  %p2279_p0 = scmp.lt.s32.totalorder %s2528_s14, %s2528_s14 }
  0x3e   :  { %p2275_p13 = scmp.ne.s32.totalorder %s2528_s14, %s2274_s18  ;;  %p2280_p1 = scmp.lt.s32.totalorder %s2274_s18, %s2274_s18 }
  0x40   :  { %p2281_p2 = por %p2280_p1, %p2279_p0 }
  0x42   :  { %p2282_p3 = pnand %p2281_p2, %p2275_p13 }
  0x44   :  { %2285 = shalt.err (!%p2282_p3)
}
  0x45   :  { %35 = dma.hbm_to_vmem [thread:$0]  %s2831_s0, 256, %s2528_s14, [#allocation4], %s2410_s15, %s2410_s15, %s2411_s16  }
  0x46   :  { %s2414_s19 = smov [#allocation8]   ;;  %s2415_s21 = smov [#allocation11]  }
  0x47   :  { %s53_s20 = sshll.u32 %s2414_s19, 4  ;;  %s79_s23 = sshll.u32 %s2415_s21, 4  ;;  %s54_s20 = int_to_ptr.vmem [resolvable:$true] %s53_s20  ;;  %s2565_s23 = int_to_ptr.vmem [resolvable:$true] %s79_s23 }
  0x48   :  { %s2286_s24 = scalar_lea.hbm %s2833_s2, 256 }
  0x49   :  { %p2287_p4 = scmp.ne.s32.totalorder %s2833_s2, %s2286_s24  ;;  %p2290_p5 = scmp.lt.u32.totalorder %s2286_s24, %s2833_s2 }
  0x4b   :  { %p2292_p6 = pnand %p2290_p5, %p2287_p4 }
  0x4d   :  { %2295 = shalt.err (!%p2292_p6)
}
  0x4e   :  { %s2296_s0 = scalar_lea.vmem %s54_s20, 256  ;;  %p2301_p8 = scmp.lt.s32.totalorder %s54_s20, %s54_s20 }
  0x4f   :  { %p2297_p7 = scmp.ne.s32.totalorder %s54_s20, %s2296_s0  ;;  %p2302_p9 = scmp.lt.s32.totalorder %s2296_s0, %s2296_s0 }
  0x51   :  { %p2303_p10 = por %p2302_p9, %p2301_p8 }
  0x53   :  { %p2304_p11 = pnand %p2303_p10, %p2297_p7 }
  0x55   :  { %2307 = shalt.err (!%p2304_p11)
}
  0x56   :  { %59 = dma.hbm_to_vmem [thread:$0]  %s2833_s2, 256, %s54_s20, [#allocation7], %s2410_s15, %s2410_s15, %s2411_s16  }
  0x57   :  { %s2308_s17 = scalar_lea.hbm %s2836_s5, 512 }
  0x58   :  { %p2309_p12 = scmp.ne.s32.totalorder %s2836_s5, %s2308_s17  ;;  %p2312_p13 = scmp.lt.u32.totalorder %s2308_s17, %s2836_s5 }
  0x5a   :  { %p2314_p0 = pnand %p2312_p13, %p2309_p12 }
  0x5c   :  { %2317 = shalt.err (!%p2314_p0)
}
  0x5d   :  { %s2318_s21 = scalar_lea.vmem %s2565_s23, 512  ;;  %p2323_p2 = scmp.lt.s32.totalorder %s2565_s23, %s2565_s23 }
  0x5e   :  { %p2319_p1 = scmp.ne.s32.totalorder %s2565_s23, %s2318_s21  ;;  %p2324_p3 = scmp.lt.s32.totalorder %s2318_s21, %s2318_s21 }
  0x60   :  { %p2325_p4 = por %p2324_p3, %p2323_p2 }
  0x62   :  { %p2326_p5 = pnand %p2325_p4, %p2319_p1 }
  0x64   :  { %2329 = shalt.err (!%p2326_p5)
}
  0x65   :  { %85 = dma.hbm_to_vmem [thread:$0]  %s2836_s5, 512, %s2565_s23, [#allocation10], %s2410_s15, %s2410_s15, %s2411_s16  }
  0x66   :  { %s2416_s25 = smov [#allocation14]   ;;  %s2330_s27 = scalar_lea.hbm %s2839_s8, 16 }
  0x67   :  { %s106_s3 = sshll.u32 %s2416_s25, 4  ;;  %p2331_p6 = scmp.ne.s32.totalorder %s2839_s8, %s2330_s27  ;;  %s107_s3 = int_to_ptr.vmem [resolvable:$true] %s106_s3 }
  0x68   :  { %p2334_p7 = scmp.lt.u32.totalorder %s2330_s27, %s2839_s8 }
  0x6a   :  { %p2336_p8 = pnand %p2334_p7, %p2331_p6 }
  0x6c   :  { %2339 = shalt.err (!%p2336_p8)
}
  0x6d   :  { %s2340_s22 = scalar_lea.vmem %s107_s3, 16  ;;  %s2344_s5 = scalar_lea.vmem %s107_s3, 32 }
  0x6e   :  { %p2341_p9 = scmp.ne.s32.totalorder %s107_s3, %s2340_s22  ;;  %p2345_p10 = scmp.lt.s32.totalorder %s107_s3, %s107_s3 }
  0x6f   :  { %p2346_p11 = scmp.lt.s32.totalorder %s2344_s5, %s2340_s22 }
  0x71   :  { %p2347_p12 = por %p2346_p11, %p2345_p10 }
  0x73   :  { %p2348_p13 = pnand %p2347_p12, %p2341_p9 }
  0x75   :  { %2351 = shalt.err (!%p2348_p13)
}
  0x76   :  { %109 = dma.hbm_to_vmem [thread:$0]  %s2839_s8, 16, %s107_s3, [#allocation13]  }
  0x77   :  { %2396 = dma.done.wait [#allocation4], 256  }
  0x78   :  { %2397 = vsyncadd [#allocation4], 4294967040 }
  0x79   :  { %2398 = dma.done.wait [#allocation7], 512  }
  0x7a   :  { %2399 = vsyncadd [#allocation7], 4294966784 }
  0x7b   :  { %2400 = dma.done.wait [#allocation10], 1024  }
  0x7c   :  { %2401 = vsyncadd [#allocation10], 4294966272 }
  0x7d   :  { %2402 = dma.done.wait [#allocation13], 528  }
  0x7e   :  { %2403 = vsyncadd [#allocation13], 4294966768  ;;  %v234_v0 = vld [vmem:[#allocation11] sm:$0xff]  ;;  %v235_v1 = vld [vmem:[#allocation11 + $0x8] sm:$0xff]  ;;  %vm152_vm0 = vcmask 261120   ;;  %v2417_v16 = vmov 0.0  }
  0x7f   :  { %v141_v2 = vld [vmem:[#allocation9] sm:$0xff]  ;;  %v2124_v3 = vpack.c.bf16 %v235_v1, %v234_v0  ;;  %v142_v4 = vld [vmem:[#allocation9 + $0x8] sm:$0xff]  ;;  %v236_v5 = vld [vmem:[#allocation11 + $0x10] sm:$0xff]  ;;  %vm2418_vm1 = vmmov 0   ;;  %vm418_vm2 = vcmask 64512   ;;  %s2419_s7 = smov 120  }
  0x80   :  { %v237_v6 = vld [vmem:[#allocation11 + $0x18] sm:$0xff]  ;;  %v2116_v7 = vpack.c.bf16 %v142_v4, %v141_v2  ;;  %v143_v9 = vld [vmem:[#allocation9 + $0x10] sm:$0xff]  ;;  %v137_v11 = vld [vmem:[#allocation6] sm:$0xff]  ;;  %s2422_s30 = smov 16   ;;  %vm1083_vm3 = vcmask 130112   ;;  %vm1424_vm4 = vcmask 195712  }
  0x81   :  { %v2128_v8 = vpack.c.bf16 %v237_v6, %v236_v5  ;;  %v144_v10 = vld [vmem:[#allocation9 + $0x18] sm:$0xff]  ;;  %2125 = vmatprep.subr.bf16.mxu1 %v2124_v3  ;;  %2011 = vmatprep.mubr.msk.f32.mxu1 %vm152_vm0, %v137_v11  ;;  %v135_v13 = vld [vmem:[#allocation3] sm:$0xff]  ;;  %v138_v14 = vld [vmem:[#allocation6 + $0x8] sm:$0xff]  ;;  %s2423_s27 = smov 24   ;;  %vm1765_vm5 = vcmask 261312  }
  0x82   :  { %v2120_v12 = vpack.c.bf16 %v144_v10, %v143_v9  ;;  %2127 = vmatpush3.bf16.msra.mxu1 %v2124_v3  ;;  %2117 = vmatprep.subr.bf16.mxu0 %v2116_v7  ;;  %v136_v15 = vld [vmem:[#allocation3 + $0x8] sm:$0xff]  ;;  %v1903_v17 = vld [vmem:[%s2837_s6] ss:$0 sm:$0xff]  ;;  %v327_v28 = vld [vmem:[#allocation12 + $0x8] sm:$0xff]  ;;  %s2421_s6 = smov 104  }
  0x83   :  { %2119 = vmatpush3.bf16.msra.mxu0 %v2116_v7  ;;  %2129 = vmatprep.subr.bf16.mxu1 %v2128_v8  ;;  %v1900_v19 = vld [vmem:[%s2835_s4] ss:$0 sm:$0xff]  ;;  %v328_v29 = vld [vmem:[#allocation12 + $0x10] sm:$0xff]  ;;  %v329_v31 = vld [vmem:[#allocation12 + $0x18] sm:$0xff]  ;;  %s2420_s4 = smov 112  }
  0x84   :  { %2121 = vmatprep.subr.bf16.mxu0 %v2120_v12  ;;  %2000 = vmatprep.mubr.msk.f32.mxu0 %vm152_vm0, %v135_v13  ;;  %v326_v27 = vld [vmem:[#allocation12] sm:$0xff]  ;;  %v139_v32 = vld [vmem:[#allocation8] sm:$0xff]  ;;  %v2136_v33 = vpack.c.bf16 %v329_v31, %v328_v29  ;;  %v140_v34 = vld [vmem:[#allocation8 + $0x8] sm:$0xff] }
  0x85   :  { %v2132_v30 = vpack.c.bf16 %v327_v28, %v326_v27  ;;  %v1906_v55 = vld [vmem:[#allocation14] ss:$0 sm:$0xff] }
  0x86   :  { %2131 = vmatpush3.bf16.msra.mxu1 %v2128_v8 }
  0x87   :  { %2123 = vmatpush3.bf16.msra.mxu0 %v2120_v12  ;;  %2025 = vmatprep.subr.mxu1 %v2417_v16 }
  0x88   :  { %2133 = vmatprep.subr.bf16.mxu0 %v2132_v30 }
  0x89   :  { %2012 = vmatmul.mubr.msk.f32.vlgmr.msra.gmra.mrb[0].mxu1 %vm152_vm0, %v138_v14 }
  0x8a   :  { %2001 = vmatmul.mubr.msk.f32.vlgmr.msra.gmra.mrb[0].mxu0 %vm152_vm0, %v136_v15  ;;  %2027 = vmatprep.mubr.msk.f32.mxu1 %vm2418_vm1, %v2417_v16 }
  0x8b   :  { %2022 = vmatprep.mubr.msk.f32.mxu0 %vm152_vm0, %v139_v32  ;;  %2135 = vmatpush3.bf16.msra.mxu0 %v2132_v30 }
  0x8c   :  { %2137 = vmatprep.subr.bf16.mxu0 %v2136_v33 }
  0x8f   :  { %2139 = vmatpush3.bf16.msra.mxu0 %v2136_v33 }
  0x90   :  { %2045 = vmatprep.subr.mxu0 %v2417_v16 }
  0x92   :  { %2023 = vmatmul.mubr.msk.f32.vlgmr.msra.gmra.mrb[2].mxu0 %vm152_vm0, %v140_v34 }
  0x93   :  { %2047 = vmatprep.mubr.msk.f32.mxu0 %vm2418_vm1, %v2417_v16 }
 0x15c   :  { %v2013_v18 = vpop.f32.mrb[0].mxu1 }
 0x15d   :  { %v2627_v20 = vadd.f32 %v2013_v18, %v1903_v17  ;;  %v317_v21 = vpop.f32.mrb[1].mxu1  ;;  %v2002_v22 = vpop.f32.mrb[0].mxu0 }
 0x15e   :  { %v2629_v23 = vadd.f32 %v1903_v17, %v317_v21  ;;  %v225_v24 = vpop.f32.mrb[1].mxu0  ;;  %v2646_v26 = vadd.f32 %v2002_v22, %v1900_v19 }
 0x15f   :  { %823 = vrot.lane.b32.xlu1 %v2627_v20, %s2419_s7  ;;  %v2633_v25 = vadd.f32 %v1900_v19, %v225_v24 }
 0x160   :  { %2026 = vmatpush3.xpose.msk.msra.mxu1 %vm418_vm2, %v2629_v23 }
 0x161   :  { %2030 = vmatprep.subr.mxu1 %v2417_v16 }
 0x163   :  { %743 = vrot.lane.b32.xlu1 %v2633_v25, %s2419_s7  ;;  %2028 = vmatmul.mubr.msk.f32.vlgmr.msra.gmra.mrb[2].mxu1 %vm418_vm2, %v2633_v25 }
 0x164   :  { %2031 = vmatpush3.xpose.msk.msra.mxu1 %vm418_vm2, %v2627_v20  ;;  %2032 = vmatprep.mubr.msk.f32.mxu1 %vm2418_vm1, %v2417_v16 }
 0x165   :  { %2035 = vmatprep.subr.mxu1 %v2417_v16  ;;  %v2024_v54 = vpop.f32.mrb[2].mxu0 }
 0x166   :  { %v409_v56 = vpop.f32.mrb[3].mxu0  ;;  %v2671_v57 = vadd.f32 %v2024_v54, %v1906_v55 }
 0x167   :  { %2033 = vmatmul.mubr.msk.f32.vlgmr.msra.gmra.mrb[4].mxu1 %vm418_vm2, %v2646_v26  ;;  %v2673_v58 = vadd.f32 %v1906_v55, %v409_v56 }
 0x168   :  { %2037 = vmatprep.mubr.msk.f32.mxu1 %vm2418_vm1, %v2417_v16 }
 0x169   :  { %2036 = vmatpush3.msra.mxu1 %v2673_v58 }
 0x16a   :  { %2040 = vmatprep.subr.mxu1 %v2417_v16 }
 0x1d1   :  { %v824_v45 = vpop.permute.xlu1 %823 }
 0x1d5   :  { %v744_v49 = vpop.permute.xlu1 %743 }
 0x236   :  { %v491_v35 = vpop.f32.mrb[2].mxu1 }
 0x237   :  { %v2029_v36 = vpop.f32.mrb[3].mxu1  ;;  %v571_v37 = vsel %vm418_vm2, %v491_v35, -inf }
 0x238   :  { %572 = vmax.xlane.f32.xlu0 %v571_v37 }
 0x23a   :  { %v567_v38 = vpop.f32.mrb[4].mxu1 }
 0x23b   :  { %v2034_v39 = vpop.f32.mrb[5].mxu1  ;;  %v574_v40 = vsel %vm418_vm2, %v567_v38, -inf }
 0x23c   :  { %575 = vmax.xlane.f32.xlu0 %v574_v40 }
 0x252   :  { %745 = vrot.lane.b32.xlu0 %v2629_v23, %s2419_s7 }
 0x2c5   :  { %v573_v41 = vpop.xlane.xlu0 %572 }
 0x2c6   :  { %v577_v42 = vsub.f32 %v491_v35, %v573_v41 }
 0x2c8   :  { %v579_v43 = vmul.f32 1.442695, %v577_v42 }
 0x2c9   :  { %v576_v44 = vpop.xlane.xlu0 %575 }
 0x2ca   :  { %2166 = vpow2.f32 %v579_v43  ;;  %v578_v46 = vsub.f32 %v567_v38, %v576_v44 }
 0x2cc   :  { %v581_v47 = vmul.f32 1.442695, %v578_v46 }
 0x2cd   :  { %v746_v48 = vpop.permute.xlu0 %745 }
 0x2ce   :  { %2168 = vpow2.f32 %v581_v47  ;;  %2046 = vmatpush3.xpose.msk.msra.mxu0 %vm418_vm2, %v746_v48 }
 0x2cf   :  { %2055 = vmatprep.subr.mxu0 %v2417_v16 }
 0x2d1   :  { %2048 = vmatmul.mubr.msk.f32.vlgmr.msra.gmra.mrb[4].mxu0 %vm418_vm2, %v744_v49 }
 0x2d2   :  { %2057 = vmatprep.mubr.msk.f32.mxu0 %vm2418_vm1, %v2417_v16 }
 0x2d4   :  { %v2167_v50 = vpop.eup %2166 }
 0x2d5   :  { %v583_v51 = vsel %vm418_vm2, %v2167_v50, 0.0 }
 0x2d6   :  { %584 = vadd.xlane.f32.xlu1 %v583_v51 }
 0x2d8   :  { %v2169_v52 = vpop.eup %2168 }
 0x2d9   :  { %v586_v53 = vsel %vm418_vm2, %v2169_v52, 0.0 }
 0x2da   :  { %587 = vadd.xlane.f32.xlu1 %v586_v53 }
 0x2eb   :  { %821 = vrot.lane.b32.xlu1 %v2646_v26, %s2419_s7 }
 0x363   :  { %v585_v59 = vpop.xlane.xlu1 %584 }
 0x364   :  { %2170 = vrcp.f32 %v585_v59 }
 0x367   :  { %v588_v60 = vpop.xlane.xlu1 %587 }
 0x368   :  { %2172 = vrcp.f32 %v588_v60 }
 0x36b   :  { %v822_v1 = vpop.permute.xlu1 %821 }
 0x36e   :  { %v2171_v61 = vpop.eup %2170 }
 0x36f   :  { %v591_v62 = vmul.f32 %v2171_v61, %v2167_v50 }
 0x371   :  { %593 = vst.msk [vmem:[#allocation16] sm:$0xff] %vm418_vm2, %v591_v62  ;;  %2038 = vmatmul.mubr.msk.f32.vlgmr.msra.gmra.mrb[6].mxu1 %vm418_vm2, %v591_v62 }
 0x372   :  { %v2173_v63 = vpop.eup %2172  ;;  %2041 = vmatpush3.msra.mxu1 %v2671_v57  ;;  %2042 = vmatprep.mubr.msk.f32.mxu1 %vm2418_vm1, %v2417_v16 }
 0x373   :  { %v592_v0 = vmul.f32 %v2173_v63, %v2169_v52  ;;  %2050 = vmatprep.subr.mxu1 %v2417_v16 }
 0x375   :  { %594 = vst.msk [vmem:[#allocation16 + $0x8] sm:$0xff] %vm418_vm2, %v592_v0  ;;  %2043 = vmatmul.mubr.msk.f32.vlgmr.msra.gmra.mrb[8].mxu1 %vm418_vm2, %v592_v0 }
 0x376   :  { %2052 = vmatprep.mubr.msk.f32.mxu1 %vm2418_vm1, %v2417_v16 }
 0x379   :  { %2051 = vmatpush3.xpose.msk.msra.mxu1 %vm418_vm2, %v824_v45 }
 0x37a   :  { %2060 = vmatprep.subr.mxu1 %v2417_v16 }
 0x37c   :  { %2053 = vmatmul.mubr.msk.f32.vlgmr.msra.gmra.mrb[10].mxu1 %vm418_vm2, %v822_v1 }
 0x37d   :  { %2062 = vmatprep.mubr.msk.f32.mxu1 %vm2418_vm1, %v2417_v16 }
 0x3a4   :  { %v817_v2 = vpop.f32.mrb[4].mxu0 }
 0x3a5   :  { %v2049_v3 = vpop.f32.mrb[5].mxu0  ;;  %v899_v4 = vsel %vm418_vm2, %v817_v2, -inf }
 0x3a6   :  { %900 = vmax.xlane.f32.xlu0 %v899_v4 }
 0x433   :  { %v901_v5 = vpop.xlane.xlu0 %900 }
 0x434   :  { %v905_v6 = vsub.f32 %v817_v2, %v901_v5 }
 0x436   :  { %v907_v7 = vmul.f32 1.442695, %v905_v6 }
 0x438   :  { %2174 = vpow2.f32 %v907_v7 }
 0x442   :  { %v2175_v8 = vpop.eup %2174 }
 0x443   :  { %v911_v9 = vsel %vm418_vm2, %v2175_v8, 0.0 }
 0x444   :  { %912 = vadd.xlane.f32.xlu0 %v911_v9  ;;  %v664_v10 = vpop.f32.mrb[6].mxu1 }
 0x445   :  { %741 = vst.msk [vmem:[#allocation2] sm:$0xff] %vm418_vm2, %v664_v10  ;;  %v2039_v11 = vpop.f32.mrb[7].mxu1 }
 0x448   :  { %v737_v12 = vpop.f32.mrb[8].mxu1 }
 0x449   :  { %742 = vst.msk [vmem:[#allocation2 + $0x8] sm:$0xff] %vm418_vm2, %v737_v12  ;;  %v2044_v13 = vpop.f32.mrb[9].mxu1 }
 0x44f   :  { %v895_v14 = vpop.f32.mrb[10].mxu1 }
 0x450   :  { %v2054_v15 = vpop.f32.mrb[11].mxu1  ;;  %v902_v17 = vsel %vm418_vm2, %v895_v14, -inf }
 0x451   :  { %903 = vmax.xlane.f32.xlu1 %v902_v17 }
 0x45a   :  { %922 = vrot.lane.b32.xlu0 %v2673_v58, %s2419_s7 }
 0x462   :  { %999 = vrot.lane.b32.xlu1 %v2671_v57, %s2419_s7 }
 0x466   :  { %1088 = vrot.lane.b32.xlu1 %v2629_v23, %s2420_s4 }
 0x46a   :  { %1166 = vrot.lane.b32.xlu1 %v2627_v20, %s2420_s4 }
 0x46e   :  { %1164 = vrot.lane.b32.xlu1 %v2646_v26, %s2420_s4 }
 0x4d1   :  { %v913_v18 = vpop.xlane.xlu0 %912 }
 0x4d2   :  { %2176 = vrcp.f32 %v913_v18 }
 0x4d5   :  { %v923_v19 = vpop.permute.xlu0 %922 }
 0x4d6   :  { %2056 = vmatpush3.msra.mxu0 %v923_v19 }
 0x4d7   :  { %2065 = vmatprep.subr.mxu0 %v2417_v16 }
 0x4dc   :  { %v2177_v21 = vpop.eup %2176 }
 0x4dd   :  { %v919_v22 = vmul.f32 %v2177_v21, %v2175_v8 }
 0x4de   :  { %v904_v24 = vpop.xlane.xlu1 %903 }
 0x4df   :  { %v906_v27 = vsub.f32 %v895_v14, %v904_v24  ;;  %2058 = vmatmul.mubr.msk.f32.vlgmr.msra.gmra.mrb[6].mxu0 %vm418_vm2, %v919_v22 }
 0x4e0   :  { %2067 = vmatprep.mubr.msk.f32.mxu0 %vm2418_vm1, %v2417_v16 }
 0x4e1   :  { %v909_v28 = vmul.f32 1.442695, %v906_v27 }
 0x4e2   :  { %v1000_v29 = vpop.permute.xlu1 %999 }
 0x4e3   :  { %2178 = vpow2.f32 %v909_v28  ;;  %2061 = vmatpush3.msra.mxu1 %v1000_v29 }
 0x4e4   :  { %2070 = vmatprep.subr.mxu1 %v2417_v16 }
 0x4e6   :  { %v1089_v30 = vpop.permute.xlu1 %1088 }
 0x4e7   :  { %2066 = vmatpush3.xpose.msk.msra.mxu0 %vm418_vm2, %v1089_v30 }
 0x4e8   :  { %2075 = vmatprep.subr.mxu0 %v2417_v16 }
 0x4ea   :  { %v1167_v36 = vpop.permute.xlu1 %1166 }
 0x4ed   :  { %v2179_v31 = vpop.eup %2178 }
 0x4ee   :  { %v914_v32 = vsel %vm418_vm2, %v2179_v31, 0.0  ;;  %v1165_v38 = vpop.permute.xlu1 %1164 }
 0x4ef   :  { %915 = vadd.xlane.f32.xlu0 %v914_v32 }
 0x505   :  { %1086 = vrot.lane.b32.xlu0 %v2633_v25, %s2420_s4 }
 0x57c   :  { %v916_v33 = vpop.xlane.xlu0 %915 }
 0x57d   :  { %2180 = vrcp.f32 %v916_v33 }
 0x580   :  { %v1087_v34 = vpop.permute.xlu0 %1086 }
 0x581   :  { %2068 = vmatmul.mubr.msk.f32.vlgmr.msra.gmra.mrb[8].mxu0 %vm418_vm2, %v1087_v34 }
 0x582   :  { %2077 = vmatprep.mubr.msk.f32.mxu0 %vm2418_vm1, %v2417_v16 }
 0x587   :  { %v2181_v35 = vpop.eup %2180 }
 0x588   :  { %v920_v37 = vmul.f32 %v2181_v35, %v2179_v31 }
 0x58a   :  { %2063 = vmatmul.mubr.msk.f32.vlgmr.msra.gmra.mrb[12].mxu1 %vm418_vm2, %v920_v37 }
 0x58b   :  { %2071 = vmatpush3.xpose.msk.msra.mxu1 %vm418_vm2, %v1167_v36  ;;  %2072 = vmatprep.mubr.msk.f32.mxu1 %vm2418_vm1, %v2417_v16 }
 0x58c   :  { %2080 = vmatprep.subr.mxu1 %v2417_v16 }
 0x58e   :  { %2073 = vmatmul.mubr.msk.f32.vlgmr.msra.gmra.mrb[14].mxu1 %vm418_vm2, %v1165_v38 }
 0x58f   :  { %2082 = vmatprep.mubr.msk.f32.mxu1 %vm2418_vm1, %v2417_v16 }
 0x5b2   :  { %v2728_v39 = vpop.f32.mrb[6].mxu0 }
 0x5b3   :  { %v2059_v40 = vpop.f32.mrb[7].mxu0 }
 0x5b4   :  { %v1771_v40 = vld [vmem:[%s2840_s9 + $0x8] sm:$0xff] }
 0x654   :  { %v1160_v41 = vpop.f32.mrb[8].mxu0 }
 0x655   :  { %v2069_v42 = vpop.f32.mrb[9].mxu0  ;;  %v1242_v43 = vsel %vm418_vm2, %v1160_v41, -inf }
 0x656   :  { %1243 = vmax.xlane.f32.xlu0 %v1242_v43  ;;  %v1772_v42 = vld [vmem:[%s2840_s9 + $0x10] sm:$0xff]  ;;  %v1773_v43 = vld [vmem:[%s2840_s9 + $0x18] sm:$0xff] }
 0x65d   :  { %v2731_v44 = vpop.f32.mrb[12].mxu1 }
 0x65e   :  { %v2064_v45 = vpop.f32.mrb[13].mxu1 }
 0x661   :  { %v1238_v46 = vpop.f32.mrb[14].mxu1 }
 0x662   :  { %v2074_v47 = vpop.f32.mrb[15].mxu1  ;;  %v1245_v48 = vsel %vm418_vm2, %v1238_v46, -inf }
 0x663   :  { %1246 = vmax.xlane.f32.xlu1 %v1245_v48 }
 0x674   :  { %1340 = vrot.lane.b32.xlu1 %v2671_v57, %s2420_s4 }
 0x678   :  { %1429 = vrot.lane.b32.xlu1 %v2629_v23, %s2421_s6 }
 0x67c   :  { %1507 = vrot.lane.b32.xlu1 %v2627_v20, %s2421_s6 }
 0x680   :  { %1505 = vrot.lane.b32.xlu1 %v2646_v26, %s2421_s6 }
 0x6e3   :  { %v1244_v49 = vpop.xlane.xlu0 %1243 }
 0x6e4   :  { %v1248_v50 = vsub.f32 %v1160_v41, %v1244_v49 }
 0x6e6   :  { %v1250_v51 = vmul.f32 1.442695, %v1248_v50 }
 0x6e8   :  { %2182 = vpow2.f32 %v1250_v51 }
 0x6f0   :  { %v1247_v52 = vpop.xlane.xlu1 %1246 }
 0x6f1   :  { %v1249_v20 = vsub.f32 %v1238_v46, %v1247_v52 }
 0x6f2   :  { %v2183_v53 = vpop.eup %2182 }
 0x6f3   :  { %v1254_v54 = vsel %vm418_vm2, %v2183_v53, 0.0  ;;  %v1252_v23 = vmul.f32 1.442695, %v1249_v20 }
 0x6f4   :  { %1255 = vadd.xlane.f32.xlu0 %v1254_v54  ;;  %v1341_v55 = vpop.permute.xlu1 %1340 }
 0x6f5   :  { %2081 = vmatpush3.msra.mxu1 %v1341_v55  ;;  %2184 = vpow2.f32 %v1252_v23 }
 0x6f6   :  { %2090 = vmatprep.subr.mxu1 %v2417_v16 }
 0x6f8   :  { %v1430_v63 = vpop.permute.xlu1 %1429 }
 0x6fc   :  { %v1508_v2 = vpop.permute.xlu1 %1507 }
 0x6ff   :  { %v2185_v26 = vpop.eup %2184 }
 0x700   :  { %v1257_v56 = vsel %vm418_vm2, %v2185_v26, 0.0  ;;  %v1506_v4 = vpop.permute.xlu1 %1505 }
 0x70a   :  { %1264 = vrot.lane.b32.xlu0 %v2673_v58, %s2420_s4 }
 0x729   :  { %1258 = vadd.xlane.f32.xlu0 %v1257_v56 }
 0x73f   :  { %1427 = vrot.lane.b32.xlu0 %v2633_v25, %s2421_s6 }
 0x781   :  { %v1256_v59 = vpop.xlane.xlu0 %1255 }
 0x782   :  { %2186 = vrcp.f32 %v1256_v59 }
 0x785   :  { %v1265_v60 = vpop.permute.xlu0 %1264 }
 0x786   :  { %2076 = vmatpush3.msra.mxu0 %v1265_v60 }
 0x787   :  { %2085 = vmatprep.subr.mxu0 %v2417_v16 }
 0x78c   :  { %v2187_v61 = vpop.eup %2186 }
 0x78d   :  { %v1262_v62 = vmul.f32 %v2187_v61, %v2183_v53 }
 0x78f   :  { %2078 = vmatmul.mubr.msk.f32.vlgmr.msra.gmra.mrb[10].mxu0 %vm418_vm2, %v1262_v62 }
 0x790   :  { %2086 = vmatpush3.xpose.msk.msra.mxu0 %vm418_vm2, %v1430_v63  ;;  %2087 = vmatprep.mubr.msk.f32.mxu0 %vm2418_vm1, %v2417_v16 }
 0x791   :  { %2095 = vmatprep.subr.mxu0 %v2417_v16 }
 0x7b6   :  { %v1259_v0 = vpop.xlane.xlu0 %1258 }
 0x7b7   :  { %2188 = vrcp.f32 %v1259_v0 }
 0x7ba   :  { %v1428_v25 = vpop.permute.xlu0 %1427 }
 0x7bb   :  { %2088 = vmatmul.mubr.msk.f32.vlgmr.msra.gmra.mrb[12].mxu0 %vm418_vm2, %v1428_v25 }
 0x7bc   :  { %2097 = vmatprep.mubr.msk.f32.mxu0 %vm2418_vm1, %v2417_v16 }
 0x7c1   :  { %v2189_v1 = vpop.eup %2188 }
 0x7c2   :  { %v1263_v3 = vmul.f32 %v2189_v1, %v2185_v26 }
 0x7c4   :  { %2083 = vmatmul.mubr.msk.f32.vlgmr.msra.gmra.mrb[16].mxu1 %vm418_vm2, %v1263_v3 }
 0x7c5   :  { %2091 = vmatpush3.xpose.msk.msra.mxu1 %vm418_vm2, %v1508_v2  ;;  %2092 = vmatprep.mubr.msk.f32.mxu1 %vm2418_vm1, %v2417_v16 }
 0x7c6   :  { %2100 = vmatprep.subr.mxu1 %v2417_v16 }
 0x7c8   :  { %2093 = vmatmul.mubr.msk.f32.vlgmr.msra.gmra.mrb[18].mxu1 %vm418_vm2, %v1506_v4 }
 0x7c9   :  { %2102 = vmatprep.mubr.msk.f32.mxu1 %vm2418_vm1, %v2417_v16 }
 0x862   :  { %v1336_v5 = vpop.f32.mrb[10].mxu0 }
 0x863   :  { %v2079_v6 = vpop.f32.mrb[11].mxu0 }
 0x88e   :  { %v1501_v7 = vpop.f32.mrb[12].mxu0 }
 0x88f   :  { %v2089_v8 = vpop.f32.mrb[13].mxu0  ;;  %v1583_v9 = vsel %vm418_vm2, %v1501_v7, -inf }
 0x890   :  { %1584 = vmax.xlane.f32.xlu0 %v1583_v9 }
 0x897   :  { %v1412_v10 = vpop.f32.mrb[16].mxu1 }
 0x898   :  { %v2084_v11 = vpop.f32.mrb[17].mxu1 }
 0x89b   :  { %v1579_v12 = vpop.f32.mrb[18].mxu1 }
 0x89c   :  { %v2094_v13 = vpop.f32.mrb[19].mxu1  ;;  %v1586_v14 = vsel %vm418_vm2, %v1579_v12, -inf }
 0x89d   :  { %1587 = vmax.xlane.f32.xlu1 %v1586_v14 }
 0x8ae   :  { %1681 = vrot.lane.b32.xlu1 %v2671_v57, %s2421_s6 }
 0x8b2   :  { %1077 = vrot.lane.b32.xlu1 %v2728_v39, %s2411_s16 }
 0x8b6   :  { %1079 = vrot.lane.b32.xlu1 %v2731_v44, %s2411_s16  ;;  %v2144_v44 = vpack.c.bf16 %v1773_v43, %v1772_v42 }
 0x8ba   :  { %1420 = vrot.lane.b32.xlu1 %v1412_v10, %s2422_s30 }
 0x91d   :  { %v1585_v16 = vpop.xlane.xlu0 %1584 }
 0x91e   :  { %v1589_v15 = vsub.f32 %v1501_v7, %v1585_v16 }
 0x920   :  { %v1591_v17 = vmul.f32 1.442695, %v1589_v15 }
 0x922   :  { %2190 = vpow2.f32 %v1591_v17 }
 0x92a   :  { %v1588_v18 = vpop.xlane.xlu1 %1587 }
 0x92b   :  { %v1590_v19 = vsub.f32 %v1579_v12, %v1588_v18 }
 0x92c   :  { %v2191_v21 = vpop.eup %2190 }
 0x92d   :  { %v1593_v22 = vmul.f32 1.442695, %v1590_v19  ;;  %v1595_v24 = vsel %vm418_vm2, %v2191_v21, 0.0 }
 0x92e   :  { %1596 = vadd.xlane.f32.xlu0 %v1595_v24  ;;  %v1682_v57 = vpop.permute.xlu1 %1681 }
 0x92f   :  { %2192 = vpow2.f32 %v1593_v22  ;;  %2101 = vmatpush3.msra.mxu1 %v1682_v57 }
 0x932   :  { %v1078_v27 = vpop.permute.xlu1 %1077 }
 0x933   :  { %1084 = vst.msk [vmem:[#allocation2] sm:$0xff] %vm1083_vm3, %v1078_v27 }
 0x936   :  { %v1080_v28 = vpop.permute.xlu1 %1079 }
 0x937   :  { %1085 = vst.msk [vmem:[#allocation2 + $0x8] sm:$0xff] %vm1083_vm3, %v1080_v28 }
 0x939   :  { %v2193_v29 = vpop.eup %2192 }
 0x93a   :  { %v1421_v30 = vpop.permute.xlu1 %1420  ;;  %v1598_v31 = vsel %vm418_vm2, %v2193_v29, 0.0 }
 0x93b   :  { %1426 = vst.msk [vmem:[#allocation2 + $0x8] sm:$0xff] %vm1424_vm4, %v1421_v30  ;;  %1599 = vadd.xlane.f32.xlu0 %v1598_v31 }
 0x951   :  { %1605 = vrot.lane.b32.xlu0 %v2673_v58, %s2421_s6  ;;  %v1770_v58 = vld [vmem:[%s2840_s9] sm:$0xff]  ;;  %s2424_s9 = smov [#allocation16]  }
 0x952   :  { %v2140_v41 = vpack.c.bf16 %v1771_v40, %v1770_v58  ;;  %s1881_s28 = sshll.u32 %s2424_s9, 4  ;;  %s1882_s28 = int_to_ptr.vmem [resolvable:$true] %s1881_s28 }
 0x953   :  { %s2352_s1 = scalar_lea.vmem %s1882_s28, 256  ;;  %p2357_p1 = scmp.lt.s32.totalorder %s1882_s28, %s1882_s28 }
 0x954   :  { %p2353_p0 = scmp.ne.s32.totalorder %s1882_s28, %s2352_s1  ;;  %p2358_p2 = scmp.lt.s32.totalorder %s2352_s1, %s2352_s1 }
 0x955   :  { %1418 = vrot.lane.b32.xlu0 %v1336_v5, %s2422_s30 }
 0x956   :  { %p2359_p3 = por %p2358_p2, %p2357_p1 }
 0x958   :  { %p2360_p4 = pnand %p2359_p3, %p2353_p0 }
 0x9bb   :  { %v1597_v32 = vpop.xlane.xlu0 %1596 }
 0x9bc   :  { %2194 = vrcp.f32 %v1597_v32 }
 0x9c6   :  { %v2195_v34 = vpop.eup %2194 }
 0x9c7   :  { %v1603_v35 = vmul.f32 %v2195_v34, %v2191_v21 }
 0x9c8   :  { %v1600_v33 = vpop.xlane.xlu0 %1599 }
 0x9c9   :  { %2196 = vrcp.f32 %v1600_v33 }
 0x9cc   :  { %v1606_v36 = vpop.permute.xlu0 %1605 }
 0x9cd   :  { %2096 = vmatpush3.msra.mxu0 %v1606_v36 }
 0x9ce   :  { %2098 = vmatmul.mubr.msk.f32.vlgmr.msra.gmra.mrb[14].mxu0 %vm418_vm2, %v1603_v35  ;;  %2141 = vmatprep.subr.bf16.mxu0 %v2140_v41 }
 0x9cf   :  { %2143 = vmatpush3.bf16.msra.mxu0 %v2140_v41 }
 0x9d0   :  { %v1419_v37 = vpop.permute.xlu0 %1418  ;;  %2145 = vmatprep.subr.bf16.mxu0 %v2144_v44 }
 0x9d1   :  { %1425 = vst.msk [vmem:[#allocation2] sm:$0xff] %vm1424_vm4, %v1419_v37 }
 0x9d3   :  { %v2197_v38 = vpop.eup %2196  ;;  %2147 = vmatpush3.bf16.msra.mxu0 %v2144_v44 }
 0x9d4   :  { %v1604_v39 = vmul.f32 %v2197_v38, %v2193_v29 }
 0x9d6   :  { %2103 = vmatmul.mubr.msk.f32.vlgmr.msra.gmra.mrb[20].mxu1 %vm418_vm2, %v1604_v39 }
 0xaa1   :  { %v1677_v45 = vpop.f32.mrb[14].mxu0 }
 0xaa2   :  { %1759 = vrot.lane.b32.xlu0 %v1677_v45, %s2423_s27  ;;  %v2099_v46 = vpop.f32.mrb[15].mxu0 }
 0xaa9   :  { %v1753_v47 = vpop.f32.mrb[20].mxu1 }
 0xaaa   :  { %1761 = vrot.lane.b32.xlu1 %v1753_v47, %s2423_s27  ;;  %v2104_v48 = vpop.f32.mrb[21].mxu1 }
 0xb14   :  { %v1760_v49 = vpop.permute.xlu0 %1759 }
 0xb15   :  { %1766 = vst.msk [vmem:[#allocation2] sm:$0xff] %vm1765_vm5, %v1760_v49 }
 0xb1c   :  { %v1762_v50 = vpop.permute.xlu1 %1761  ;;  %v1768_v51 = vld [vmem:[#allocation2] sm:$0xff] }
 0xb1d   :  { %1767 = vst.msk [vmem:[#allocation2 + $0x8] sm:$0xff] %vm1765_vm5, %v1762_v50  ;;  %2113 = vmatprep.mubr.msk.f32.mxu0 %vm152_vm0, %v1768_v51 }
 0xb24   :  { %v1769_v52 = vld [vmem:[#allocation2 + $0x8] sm:$0xff] }
 0xb25   :  { %2114 = vmatmul.mubr.msk.f32.vlgmr.msra.gmra.mrb[16].mxu0 %vm152_vm0, %v1769_v52 }
 0xb26   :  { %2363 = shalt.err (!%p2360_p4)
}
 0xb27   :  { %s2364_s22 = scalar_lea.hbm %s2843_s12, 256 }
 0xb28   :  { %p2365_p5 = scmp.ne.s32.totalorder %s2843_s12, %s2364_s22  ;;  %p2368_p6 = scmp.lt.u32.totalorder %s2364_s22, %s2843_s12 }
 0xb2a   :  { %p2370_p7 = pnand %p2368_p6, %p2365_p5 }
 0xb2c   :  { %2373 = shalt.err (!%p2370_p7)
}
 0xb2d   :  { %1887 = dma.vmem_to_hbm [thread:$0]  %s1882_s28, 256, %s2843_s12, [#allocation17], %s2410_s15, %s2410_s15, %s2411_s16  }
 0xb2e   :  { %v1933_v53 = vld [vmem:[%s2841_s10] ss:$0 sm:$0xff]  ;;  %s2425_s4 = smov [#allocation15]  }
 0xb2f   :  { %s1869_s6 = sshll.u32 %s2425_s4, 4  ;;  %s1870_s6 = int_to_ptr.vmem [resolvable:$true] %s1869_s6 }
 0xb30   :  { %s2374_s30 = scalar_lea.vmem %s1870_s6, 256  ;;  %p2379_p9 = scmp.lt.s32.totalorder %s1870_s6, %s1870_s6 }
 0xb31   :  { %p2375_p8 = scmp.ne.s32.totalorder %s1870_s6, %s2374_s30  ;;  %p2380_p10 = scmp.lt.s32.totalorder %s2374_s30, %s2374_s30 }
 0xb33   :  { %p2381_p11 = por %p2380_p10, %p2379_p9 }
 0xb35   :  { %p2382_p12 = pnand %p2381_p11, %p2375_p8 }
 0xbf8   :  { %v2115_v54 = vpop.f32.mrb[16].mxu0 }
 0xbf9   :  { %v1859_v55 = vadd.f32 %v2115_v54, %v1933_v53  ;;  %v1853_v20 = vpop.f32.mrb[17].mxu0 }
 0xbfa   :  { %v1854_v23 = vadd.f32 %v1933_v53, %v1853_v20 }
 0xbfb   :  { %1863 = vst.msk [vmem:[#allocation15 + $0x8] sm:$0xff] %vm152_vm0, %v1859_v55 }
 0xbfc   :  { %1862 = vst.msk [vmem:[#allocation15] sm:$0xff] %vm152_vm0, %v1854_v23 }
 0xbfd   :  { %2385 = shalt.err (!%p2382_p12)
}
 0xbfe   :  { %s2386_s19 = scalar_lea.hbm %s2842_s11, 256 }
 0xbff   :  { %p2387_p13 = scmp.ne.s32.totalorder %s2842_s11, %s2386_s19  ;;  %p2390_p0 = scmp.lt.u32.totalorder %s2386_s19, %s2842_s11 }
 0xc01   :  { %p2392_p1 = pnand %p2390_p0, %p2387_p13 }
 0xc03   :  { %2395 = shalt.err (!%p2392_p1)
}
 0xc04   :  { %1875 = dma.vmem_to_hbm [thread:$0]  %s1870_s6, 256, %s2842_s11, [#allocation5], %s2410_s15, %s2410_s15, %s2411_s16  }
 0xc05   :  { %2404 = dma.done.wait [#allocation5], 256  }
 0xc06   :  { %2405 = vsyncadd [#allocation5], 4294967040 }
 0xc07   :  { %2406 = dma.done.wait [#allocation17], 256  }
 0xc08   :  { %2407 = vsyncadd [#allocation17], 4294967040 }
 0xc09   :  { %1894 = vsyncpa [#allocation4], 1 }
 0xc0a   :  { %1895 = vsyncpa [#allocation7], 1 }
 0xc0b   :  { %1896 = vsyncpa [#allocation10], 1 }
 0xc0c   :  { %1897 = vsyncpa [#allocation13], 1 }
 0xc0d   :  { %1898 = vsyncpa [#allocation5], 1 }
 0xc0e   :  { %1899 = vsyncpa [#allocation17], 1 }

</bundles_post_ra>
